<compile_context>
chip_gen: v6e
topology: v6e:2x2x1
jax: 0.10.0
libtpu: 0.0.40
codegen_flags: <defaults>
</compile_context>

<pallas_src>
import jax
import jax.numpy as jnp
from jax.experimental import pallas as pl
from jax.experimental.pallas import tpu as pltpu


def _mlp_kernel(x_ref,
                w1_ref, b1_ref,
                w2_ref, b2_ref,
                w3_ref, b3_ref,
                w4_ref, b4_ref,
                o_ref):
    """Fused 4-layer MLP forward for one batch tile.

    x_ref: (TILE_B, D) bf16.  w{1,2,3}_ref: (in, out) bf16.  b{1,2,3}_ref: (1, out) f32.
    w4_ref: (1, hidden_last) f32 (final layer as VPU reduction).  b4_ref: (1, 1) f32.
    """
    h = jnp.dot(x_ref[...], w1_ref[...], preferred_element_type=jnp.float32) + b1_ref[...]
    h = jnp.maximum(h, 0.0)
    # TODO(synk): nn.Dropout(p) is identity in eval/inference mode; training-mode dropout
    # (pltpu.prng_random_bits based masking) intentionally not emitted here.
    h = jnp.dot(h.astype(jnp.bfloat16), w2_ref[...], preferred_element_type=jnp.float32) + b2_ref[...]
    h = jnp.maximum(h, 0.0)
    h = jnp.dot(h.astype(jnp.bfloat16), w3_ref[...], preferred_element_type=jnp.float32) + b3_ref[...]
    h = jnp.maximum(h, 0.0)
    # Final hidden_last -> 1 layer: an N=1 matmul uses 1/256 of the MXU columns, so do it on
    # the (otherwise idle) VPU/XLU slots instead: elementwise multiply + lane reduction.
    out = jnp.sum(h * w4_ref[...], axis=-1, keepdims=True) + b4_ref[...]
    o_ref[...] = out.astype(o_ref.dtype)


def jailbreak_detector_forward(x, params, tile_b=128):
    """x: (batch, encoder_dim) f32. params: list of (W_t, b), W_t shape (in, out), b shape (1, out).

    tile_b: batch rows per grid step. 128 saturates v5e's 4x128^2 MXU; use 256 on v6e/v7x if desired.
    """
    (w1, b1), (w2, b2), (w3, b3), (w4, b4) = params
    batch, encoder_dim = x.shape

    # MXU-side dtypes: bf16 operands, f32 accumulation. Biases / ReLU stay f32.
    x_bf = x.astype(jnp.bfloat16)
    w1b = w1.astype(jnp.bfloat16)
    w2b = w2.astype(jnp.bfloat16)
    w3b = w3.astype(jnp.bfloat16)
    w4_row = w4.astype(jnp.float32).T            # (1, hidden_last) for the VPU reduction
    b1f = b1.astype(jnp.float32)
    b2f = b2.astype(jnp.float32)
    b3f = b3.astype(jnp.float32)
    b4f = b4.astype(jnp.float32)

    # Pad batch to a tile multiple (rows are independent; padding rows discarded below).
    n_tiles = pl.cdiv(batch, tile_b)
    padded = n_tiles * tile_b
    if padded != batch:
        x_bf = jnp.pad(x_bf, ((0, padded - batch), (0, 0)))

    # Weights/biases: constant index_map -> loaded once, VMEM-resident across all batch tiles.
    resident = lambda arr: pl.BlockSpec(arr.shape, lambda i: (0, 0))

    out = pl.pallas_call(
        _mlp_kernel,
        out_shape=jax.ShapeDtypeStruct((padded, 1), jnp.float32),
        grid=(n_tiles,),
        in_specs=[pl.BlockSpec((tile_b, encoder_dim), lambda i: (i, 0)),
                  resident(w1b), resident(b1f),
                  resident(w2b), resident(b2f),
                  resident(w3b), resident(b3f),
                  resident(w4_row), resident(b4f)],
        out_specs=pl.BlockSpec((tile_b, 1), lambda i: (i, 0)),
        compiler_params=pltpu.CompilerParams(
            dimension_semantics=("parallel",),   # megacore sharding of batch tiles on v7x
            vmem_limit_bytes=24 << 20,           # bf16 weights + double-buffered tiles fit easily
        ),
    )(x_bf, w1b, b1f, w2b, b2f, w3b, b3f, w4_row, b4f)
    return out[:batch]


def init_params(key, encoder_dim, hidden_dims):
    """Deterministic init mimicking PyTorch nn.Linear default (uniform +-1/sqrt(fan_in)).
    Weights returned pre-transposed to (in_dim, out_dim), f32 (cast to bf16 in the wrapper)."""
    dims = [encoder_dim] + list(hidden_dims) + [1]
    params = []
    for i in range(len(dims) - 1):
        d_in, d_out = dims[i], dims[i + 1]
        key, kw, kb = jax.random.split(key, 3)
        bound = 1.0 / (d_in ** 0.5)
        w_t = jax.random.uniform(kw, (d_in, d_out), jnp.float32, -bound, bound)
        b = jax.random.uniform(kb, (1, d_out), jnp.float32, -bound, bound)
        params.append((w_t, b))
    return params


def reference_forward(x, params):
    """Pure-JAX reference matching the kernel's numeric path exactly:
    bf16 MXU operands with f32 accumulation, f32 bias/ReLU, final layer as an f32 reduction.
    (A pure-f32 PyTorch-style reference differs only by bf16 rounding, ~1e-2 relative.)"""
    h = x.astype(jnp.float32)
    n = len(params)
    for i, (w_t, b) in enumerate(params):
        if i < n - 1:
            h = jnp.dot(h.astype(jnp.bfloat16), w_t.astype(jnp.bfloat16),
                        preferred_element_type=jnp.float32) + b
            h = jnp.maximum(h, 0.0)
        else:
            h = jnp.sum(h * w_t.astype(jnp.float32).T, axis=-1, keepdims=True) + b
    return h


if __name__ == "__main__":
    # Small shapes consistent with forward(x: (batch, encoder_dim)) -> (batch, 1).
    batch = 2
    encoder_dim = 32
    hidden_dims = [128, 64, 32]   # scaled-down analog of default [1024, 512, 256]

    key = jax.random.PRNGKey(0)
    key, kx = jax.random.split(key)
    x = jax.random.normal(kx, (batch, encoder_dim), jnp.float32)

    params = init_params(jax.random.PRNGKey(0), encoder_dim, hidden_dims)

    logits = jailbreak_detector_forward(x, params)
    logits = jax.block_until_ready(logits)

    ref = reference_forward(x, params)
    assert logits.shape == (batch, 1), logits.shape
    assert jnp.allclose(logits, ref, atol=1e-3, rtol=1e-3), (logits, ref)

    print("KERNEL_OK")
</pallas_src>

<mosaic_0001>
module attributes {stable_mosaic.version = 11 : i64} {
  func.func @_mlp_kernel(%arg0: i32, %arg1: memref<128x32xbf16, #tpu.memory_space<vmem>>, %arg2: memref<32x128xbf16, #tpu.memory_space<vmem>>, %arg3: memref<1x128xf32, #tpu.memory_space<vmem>>, %arg4: memref<128x64xbf16, #tpu.memory_space<vmem>>, %arg5: memref<1x64xf32, #tpu.memory_space<vmem>>, %arg6: memref<64x32xbf16, #tpu.memory_space<vmem>>, %arg7: memref<1x32xf32, #tpu.memory_space<vmem>>, %arg8: memref<1x32xf32, #tpu.memory_space<vmem>>, %arg9: memref<1x1xf32, #tpu.memory_space<vmem>>, %arg10: memref<128x1xf32, #tpu.memory_space<vmem>>) attributes {dimension_semantics = [#tpu.dimension_semantics<parallel>], iteration_bounds = array<i64: 1>, scalar_prefetch = 0 : i64, scratch_operands = 0 : i64, tpu.core_type = #tpu.core_type<tc>, window_params = [{transform_indices = @transform_0, window_bounds = array<i64: 128, 32>}, {pipeline_mode = #tpu.pipeline_mode<synchronous>, transform_indices = @transform_1, window_bounds = array<i64: 32, 128>}, {pipeline_mode = #tpu.pipeline_mode<synchronous>, transform_indices = @transform_2, window_bounds = array<i64: 1, 128>}, {pipeline_mode = #tpu.pipeline_mode<synchronous>, transform_indices = @transform_3, window_bounds = array<i64: 128, 64>}, {pipeline_mode = #tpu.pipeline_mode<synchronous>, transform_indices = @transform_4, window_bounds = array<i64: 1, 64>}, {pipeline_mode = #tpu.pipeline_mode<synchronous>, transform_indices = @transform_5, window_bounds = array<i64: 64, 32>}, {pipeline_mode = #tpu.pipeline_mode<synchronous>, transform_indices = @transform_6, window_bounds = array<i64: 1, 32>}, {pipeline_mode = #tpu.pipeline_mode<synchronous>, transform_indices = @transform_7, window_bounds = array<i64: 1, 32>}, {pipeline_mode = #tpu.pipeline_mode<synchronous>, transform_indices = @transform_8, window_bounds = array<i64: 1, 1>}, {transform_indices = @transform_9, window_bounds = array<i64: 128, 1>}]} {
    %c0 = arith.constant 0 : index
    %c0_0 = arith.constant 0 : index
    %0 = vector.load %arg1[%c0, %c0_0] : memref<128x32xbf16, #tpu.memory_space<vmem>>, vector<128x32xbf16>
    %c0_1 = arith.constant 0 : index
    %c0_2 = arith.constant 0 : index
    %1 = vector.load %arg2[%c0_1, %c0_2] : memref<32x128xbf16, #tpu.memory_space<vmem>>, vector<32x128xbf16>
    %cst = arith.constant dense<0.000000e+00> : vector<128x128xf32>
    %2 = tpu.matmul %0, %1, %cst {dimension_numbers = #tpu.dot_dimension_numbers<[1], [0], [0], [1], [0, 0, 1, 1], [], []>} : vector<128x32xbf16>, vector<32x128xbf16>, vector<128x128xf32> -> vector<128x128xf32>
    %c0_3 = arith.constant 0 : index
    %c0_4 = arith.constant 0 : index
    %3 = vector.load %arg3[%c0_3, %c0_4] : memref<1x128xf32, #tpu.memory_space<vmem>>, vector<1x128xf32>
    %4 = vector.broadcast %3 : vector<1x128xf32> to vector<128x128xf32>
    %5 = arith.addf %2, %4 : vector<128x128xf32>
    %cst_5 = arith.constant 0.000000e+00 : f32
    %6 = vector.broadcast %cst_5 : f32 to vector<128x128xf32>
    %7 = arith.maximumf %5, %6 : vector<128x128xf32>
    %8 = arith.truncf %7 : vector<128x128xf32> to vector<128x128xbf16>
    %c0_6 = arith.constant 0 : index
    %c0_7 = arith.constant 0 : index
    %9 = vector.load %arg4[%c0_6, %c0_7] : memref<128x64xbf16, #tpu.memory_space<vmem>>, vector<128x64xbf16>
    %cst_8 = arith.constant dense<0.000000e+00> : vector<128x64xf32>
    %10 = tpu.matmul %8, %9, %cst_8 {dimension_numbers = #tpu.dot_dimension_numbers<[1], [0], [0], [1], [0, 0, 1, 1], [], []>} : vector<128x128xbf16>, vector<128x64xbf16>, vector<128x64xf32> -> vector<128x64xf32>
    %c0_9 = arith.constant 0 : index
    %c0_10 = arith.constant 0 : index
    %11 = vector.load %arg5[%c0_9, %c0_10] : memref<1x64xf32, #tpu.memory_space<vmem>>, vector<1x64xf32>
    %12 = vector.broadcast %11 : vector<1x64xf32> to vector<128x64xf32>
    %13 = arith.addf %10, %12 : vector<128x64xf32>
    %cst_11 = arith.constant 0.000000e+00 : f32
    %14 = vector.broadcast %cst_11 : f32 to vector<128x64xf32>
    %15 = arith.maximumf %13, %14 : vector<128x64xf32>
    %16 = arith.truncf %15 : vector<128x64xf32> to vector<128x64xbf16>
    %c0_12 = arith.constant 0 : index
    %c0_13 = arith.constant 0 : index
    %17 = vector.load %arg6[%c0_12, %c0_13] : memref<64x32xbf16, #tpu.memory_space<vmem>>, vector<64x32xbf16>
    %cst_14 = arith.constant dense<0.000000e+00> : vector<128x32xf32>
    %18 = tpu.matmul %16, %17, %cst_14 {dimension_numbers = #tpu.dot_dimension_numbers<[1], [0], [0], [1], [0, 0, 1, 1], [], []>} : vector<128x64xbf16>, vector<64x32xbf16>, vector<128x32xf32> -> vector<128x32xf32>
    %c0_15 = arith.constant 0 : index
    %c0_16 = arith.constant 0 : index
    %19 = vector.load %arg7[%c0_15, %c0_16] : memref<1x32xf32, #tpu.memory_space<vmem>>, vector<1x32xf32>
    %20 = vector.broadcast %19 : vector<1x32xf32> to vector<128x32xf32>
    %21 = arith.addf %18, %20 : vector<128x32xf32>
    %cst_17 = arith.constant 0.000000e+00 : f32
    %22 = vector.broadcast %cst_17 : f32 to vector<128x32xf32>
    %23 = arith.maximumf %21, %22 : vector<128x32xf32>
    %c0_18 = arith.constant 0 : index
    %c0_19 = arith.constant 0 : index
    %24 = vector.load %arg8[%c0_18, %c0_19] : memref<1x32xf32, #tpu.memory_space<vmem>>, vector<1x32xf32>
    %25 = vector.broadcast %24 : vector<1x32xf32> to vector<128x32xf32>
    %26 = arith.mulf %23, %25 : vector<128x32xf32>
    %cst_20 = arith.constant dense<0.000000e+00> : vector<128xf32>
    %27 = vector.multi_reduction <add>, %26, %cst_20 [1] : vector<128x32xf32> to vector<128xf32>
    %28 = vector.shape_cast %27 : vector<128xf32> to vector<128x1xf32>
    %c0_21 = arith.constant 0 : index
    %c0_22 = arith.constant 0 : index
    %29 = vector.load %arg9[%c0_21, %c0_22] : memref<1x1xf32, #tpu.memory_space<vmem>>, vector<1x1xf32>
    %30 = vector.broadcast %29 : vector<1x1xf32> to vector<128x1xf32>
    %31 = arith.addf %28, %30 : vector<128x1xf32>
    %c0_23 = arith.constant 0 : index
    %c0_24 = arith.constant 0 : index
    %32 = vector.load %arg10[%c0_23, %c0_24] : memref<128x1xf32, #tpu.memory_space<vmem>>, vector<128x1xf32>
    tpu.vector_store %arg10[%c0_23, %c0_24], %31 {strides = array<i32>} : memref<128x1xf32, #tpu.memory_space<vmem>>, vector<128x1xf32>,
    return
  }
  func.func @transform_0(%arg0: i32) -> (i32, i32) {
    %c0_i32 = arith.constant 0 : i32
    %c0_i32_0 = arith.constant 0 : i32
    return %arg0, %c0_i32 : i32, i32
  }
  func.func @transform_1(%arg0: i32) -> (i32, i32) {
    %c0_i32 = arith.constant 0 : i32
    %c0_i32_0 = arith.constant 0 : i32
    %c0_i32_1 = arith.constant 0 : i32
    return %c0_i32, %c0_i32_0 : i32, i32
  }
  func.func @transform_2(%arg0: i32) -> (i32, i32) {
    %c0_i32 = arith.constant 0 : i32
    %c0_i32_0 = arith.constant 0 : i32
    %c0_i32_1 = arith.constant 0 : i32
    return %c0_i32, %c0_i32_0 : i32, i32
  }
  func.func @transform_3(%arg0: i32) -> (i32, i32) {
    %c0_i32 = arith.constant 0 : i32
    %c0_i32_0 = arith.constant 0 : i32
    %c0_i32_1 = arith.constant 0 : i32
    return %c0_i32, %c0_i32_0 : i32, i32
  }
  func.func @transform_4(%arg0: i32) -> (i32, i32) {
    %c0_i32 = arith.constant 0 : i32
    %c0_i32_0 = arith.constant 0 : i32
    %c0_i32_1 = arith.constant 0 : i32
    return %c0_i32, %c0_i32_0 : i32, i32
  }
  func.func @transform_5(%arg0: i32) -> (i32, i32) {
    %c0_i32 = arith.constant 0 : i32
    %c0_i32_0 = arith.constant 0 : i32
    %c0_i32_1 = arith.constant 0 : i32
    return %c0_i32, %c0_i32_0 : i32, i32
  }
  func.func @transform_6(%arg0: i32) -> (i32, i32) {
    %c0_i32 = arith.constant 0 : i32
    %c0_i32_0 = arith.constant 0 : i32
    %c0_i32_1 = arith.constant 0 : i32
    return %c0_i32, %c0_i32_0 : i32, i32
  }
  func.func @transform_7(%arg0: i32) -> (i32, i32) {
    %c0_i32 = arith.constant 0 : i32
    %c0_i32_0 = arith.constant 0 : i32
    %c0_i32_1 = arith.constant 0 : i32
    return %c0_i32, %c0_i32_0 : i32, i32
  }
  func.func @transform_8(%arg0: i32) -> (i32, i32) {
    %c0_i32 = arith.constant 0 : i32
    %c0_i32_0 = arith.constant 0 : i32
    %c0_i32_1 = arith.constant 0 : i32
    return %c0_i32, %c0_i32_0 : i32, i32
  }
  func.func @transform_9(%arg0: i32) -> (i32, i32) {
    %c0_i32 = arith.constant 0 : i32
    %c0_i32_0 = arith.constant 0 : i32
    return %arg0, %c0_i32 : i32, i32
  }
}

</mosaic_0001>

<bundles_post_ra>
// kernel: tpu_custom_call.1
= control target key start
LH: loop header
LB: loop body
LE: loop exit
PB: predicated region body
PF: predicated region fallthrough
CT: control target
= control target key end

     0   :  { %vm114_vm0 = vcmask 261120   ;;  %vm491_vm1 = vcmask 523264   ;;  %vm723_vm2 = vcmask 7168   ;;  %s1186_s1 = inlined_call_operand.vmem [shape: bf16[32,128], index: 1, kind: input, shape index: {}]   ;;  %s1187_s0 = inlined_call_operand.vmem [shape: bf16[128,32], index: 0, kind: input, shape index: {}]   ;;  %s1188_s3 = inlined_call_operand.vmem [shape: bf16[128,64], index: 3, kind: input, shape index: {}]   ;;  %s1189_s5 = inlined_call_operand.vmem [shape: bf16[64,32], index: 5, kind: input, shape index: {}]   ;;  %s1190_s2 = inlined_call_operand.vmem [shape: f32[1,128], index: 2, kind: input, shape index: {}]   ;;  %s1191_s4 = inlined_call_operand.vmem [shape: f32[1,64], index: 4, kind: input, shape index: {}]   ;;  %s1192_s8 = inlined_call_operand.<no memory space> [shape: f32[1,1], index: 8, kind: input, shape index: {}]   ;;  %s1193_s6 = inlined_call_operand.vmem [shape: f32[1,32], index: 6, kind: input, shape index: {}]   ;;  %s1194_s7 = inlined_call_operand.vmem [shape: f32[1,32], index: 7, kind: input, shape index: {}]   ;;  %s1195_s9 = inlined_call_operand.vmem [shape: f32[128,1], index: 9, kind: output, shape index: {}]  }
   0x1   :  { %v901_v0 = vld [vmem:[%s1186_s1 + $0x8] sm:$0xff]   ;;  %v902_v1 = vld [vmem:[%s1186_s1] sm:$0xff]   ;;  %v905_v4 = vld [vmem:[%s1187_s0 + $0x10] sm:$0xff]  }
   0x2   :  { %825 = vmatprep.subr.bf16.mxu0 %v901_v0  ;;  %v903_v2 = vld [vmem:[%s1187_s0] sm:$0xff]   ;;  %v904_v3 = vld [vmem:[%s1187_s0 + $0x8] sm:$0xff]   ;;  %v911_v5 = vld [vmem:[%s1188_s3 + $0x38] sm:$0xff]  }
   0x3   :  { %826 = vmatpush3.bf16.msra.mxu0 %v901_v0  ;;  %829 = vmatprep.mubr.msk.bf16.mxu0 %vm114_vm0, %v903_v2  ;;  %v912_v6 = vld [vmem:[%s1188_s3 + $0x30] sm:$0xff]   ;;  %v906_v7 = vld [vmem:[%s1187_s0 + $0x18] sm:$0xff]   ;;  %v907_v8 = vld [vmem:[%s1187_s0 + $0x20] sm:$0xff]  }
   0x4   :  { %827 = vmatprep.subr.bf16.mxu0 %v902_v1  ;;  %845 = vmatprep.subr.bf16.mxu1 %v911_v5  ;;  %v913_v9 = vld [vmem:[%s1188_s3 + $0x28] sm:$0xff]   ;;  %v914_v10 = vld [vmem:[%s1188_s3 + $0x20] sm:$0xff]   ;;  %v915_v12 = vld [vmem:[%s1188_s3 + $0x18] sm:$0xff]  }
   0x5   :  { %846 = vmatpush3.bf16.msra.mxu1 %v911_v5  ;;  %v908_v11 = vld [vmem:[%s1187_s0 + $0x28] sm:$0xff]   ;;  %v909_v13 = vld [vmem:[%s1187_s0 + $0x30] sm:$0xff]   ;;  %v910_v14 = vld [vmem:[%s1187_s0 + $0x38] sm:$0xff]  }
   0x6   :  { %847 = vmatprep.subr.bf16.mxu1 %v912_v6  ;;  %v916_v15 = vld [vmem:[%s1188_s3 + $0x10] sm:$0xff]   ;;  %v917_v16 = vld [vmem:[%s1188_s3 + $0x8] sm:$0xff]   ;;  %v918_v17 = vld [vmem:[%s1188_s3] sm:$0xff]  }
   0x7   :  { %828 = vmatpush3.bf16.msra.mxu0 %v902_v1  ;;  %v919_v18 = vld [vmem:[%s1189_s5 + $0x18] sm:$0xff]   ;;  %v920_v19 = vld [vmem:[%s1189_s5 + $0x10] sm:$0xff]   ;;  %v921_v20 = vld [vmem:[%s1189_s5 + $0x8] sm:$0xff]  }
   0x8   :  { %877 = vmatprep.subr.bf16.mxu0 %v919_v18  ;;  %v744_v23 = vld [vmem:[%s1190_s2] ss:$0 sm:$0xff] }
   0x9   :  { %848 = vmatpush3.bf16.msra.mxu1 %v912_v6 }
   0xa   :  { %830 = vmatmul.mubr.msk.bf16.vlgmr.msra.gmra.mxu0 %vm114_vm0, %v904_v3  ;;  %849 = vmatprep.subr.bf16.mxu1 %v913_v9 }
   0xb   :  { %833 = vmatprep.mubr.msk.bf16.mxu0 %vm114_vm0, %v905_v4  ;;  %878 = vmatpush3.bf16.msra.mxu0 %v919_v18 }
   0xc   :  { %879 = vmatprep.subr.bf16.mxu0 %v920_v19 }
   0xd   :  { %850 = vmatpush3.bf16.msra.mxu1 %v913_v9 }
   0xe   :  { %851 = vmatprep.subr.bf16.mxu1 %v914_v10 }
   0xf   :  { %880 = vmatpush3.bf16.msra.mxu0 %v920_v19 }
  0x10   :  { %881 = vmatprep.subr.bf16.mxu0 %v921_v20 }
  0x11   :  { %852 = vmatpush3.bf16.msra.mxu1 %v914_v10 }
  0x12   :  { %834 = vmatmul.mubr.msk.bf16.gmra.mxu0 %vm114_vm0, %v906_v7  ;;  %853 = vmatprep.subr.bf16.mxu1 %v915_v12 }
  0x13   :  { %837 = vmatprep.mubr.msk.bf16.mxu0 %vm114_vm0, %v907_v8  ;;  %882 = vmatpush3.bf16.msra.mxu0 %v921_v20 }
  0x15   :  { %854 = vmatpush3.bf16.msra.mxu1 %v915_v12 }
  0x16   :  { %855 = vmatprep.subr.bf16.mxu1 %v916_v15 }
  0x19   :  { %856 = vmatpush3.bf16.msra.mxu1 %v916_v15 }
  0x1a   :  { %838 = vmatmul.mubr.msk.bf16.gmra.mxu0 %vm114_vm0, %v908_v11  ;;  %857 = vmatprep.subr.bf16.mxu1 %v917_v16 }
  0x1b   :  { %841 = vmatprep.mubr.msk.bf16.mxu0 %vm114_vm0, %v909_v13 }
  0x1d   :  { %858 = vmatpush3.bf16.msra.mxu1 %v917_v16 }
  0x1e   :  { %859 = vmatprep.subr.bf16.mxu1 %v918_v17 }
  0x21   :  { %860 = vmatpush3.bf16.msra.mxu1 %v918_v17  ;;  %v763_v17 = vld [vmem:[%s1191_s4] ss:$0 sm:$0xff] }
  0x22   :  { %842 = vmatmul.mubr.msk.bf16.gmra.mxu0 %vm114_vm0, %v910_v14  ;;  %v922_v14 = vld [vmem:[%s1189_s5] sm:$0xff]  }
  0x23   :  { %883 = vmatprep.subr.bf16.mxu0 %v922_v14 }
  0x24   :  { %884 = vmatpush3.bf16.msra.mxu0 %v922_v14 }
  0xca   :  { %v831_v21 = vpop.f32.mrf.mxu0 }
  0xcb   :  { %v182_v27 = vadd.f32 %v831_v21, %v744_v23 }
  0xcc   :  { %v173_v22 = vpop.f32.mrf.mxu0 }
  0xcd   :  { %v174_v25 = vadd.f32 %v744_v23, %v173_v22  ;;  %v238_v34 = vmax.f32 %v182_v27, 0.0 }
  0xce   :  { %v832_v24 = vpop.f32.mrf.mxu0 }
  0xcf   :  { %v185_v26 = vadd.f32 %v832_v24, %v744_v23  ;;  %v236_v32 = vmax.f32 %v174_v25, 0.0 }
  0xd0   :  { %v176_v28 = vpop.f32.mrf.mxu0 }
  0xd1   :  { %v177_v29 = vadd.f32 %v744_v23, %v176_v28  ;;  %v239_v30 = vmax.f32 %v185_v26, 0.0 }
  0xd2   :  { %v835_v31 = vpop.f32.mrf.mxu0 }
  0xd3   :  { %v237_v33 = vmax.f32 %v177_v29, 0.0  ;;  %v253_v37 = vpack.c.bf16 %v239_v30, %v238_v34  ;;  %v198_v41 = vadd.f32 %v835_v31, %v744_v23 }
  0xd4   :  { %v189_v35 = vpop.f32.mrf.mxu0 }
  0xd5   :  { %v252_v36 = vpack.c.bf16 %v237_v33, %v236_v32  ;;  %v190_v39 = vadd.f32 %v744_v23, %v189_v35  ;;  %v242_v48 = vmax.f32 %v198_v41, 0.0 }
  0xd6   :  { %v836_v38 = vpop.f32.mrf.mxu0 }
  0xd7   :  { %v201_v40 = vadd.f32 %v836_v38, %v744_v23  ;;  %861 = vmatprep.mubr.bf16.mxu1 %v252_v36  ;;  %v240_v46 = vmax.f32 %v190_v39, 0.0 }
  0xd8   :  { %v192_v42 = vpop.f32.mrf.mxu0  ;;  %862 = vmatmul.mubr.bf16.vlgmr.msra.gmra.mxu1 %v253_v37 }
  0xd9   :  { %v193_v43 = vadd.f32 %v744_v23, %v192_v42  ;;  %v243_v44 = vmax.f32 %v201_v40, 0.0 }
  0xda   :  { %v839_v45 = vpop.f32.mrf.mxu0 }
  0xdb   :  { %v241_v47 = vmax.f32 %v193_v43, 0.0  ;;  %v255_v51 = vpack.c.bf16 %v243_v44, %v242_v48  ;;  %v214_v55 = vadd.f32 %v839_v45, %v744_v23 }
  0xdc   :  { %v205_v49 = vpop.f32.mrf.mxu0 }
  0xdd   :  { %v254_v50 = vpack.c.bf16 %v241_v47, %v240_v46  ;;  %v206_v53 = vadd.f32 %v744_v23, %v205_v49  ;;  %v246_v62 = vmax.f32 %v214_v55, 0.0 }
  0xde   :  { %v840_v52 = vpop.f32.mrf.mxu0 }
  0xdf   :  { %v217_v54 = vadd.f32 %v840_v52, %v744_v23  ;;  %865 = vmatprep.mubr.bf16.mxu1 %v254_v50  ;;  %v244_v60 = vmax.f32 %v206_v53, 0.0 }
  0xe0   :  { %v208_v56 = vpop.f32.mrf.mxu0  ;;  %866 = vmatmul.mubr.bf16.gmra.mxu1 %v255_v51 }
  0xe1   :  { %v209_v57 = vadd.f32 %v744_v23, %v208_v56  ;;  %v247_v58 = vmax.f32 %v217_v54, 0.0 }
  0xe2   :  { %v843_v59 = vpop.f32.mrf.mxu0 }
  0xe3   :  { %v245_v61 = vmax.f32 %v209_v57, 0.0  ;;  %v257_v1 = vpack.c.bf16 %v247_v58, %v246_v62  ;;  %v230_v5 = vadd.f32 %v843_v59, %v744_v23 }
  0xe4   :  { %v221_v63 = vpop.f32.mrf.mxu0 }
  0xe5   :  { %v256_v0 = vpack.c.bf16 %v245_v61, %v244_v60  ;;  %v222_v3 = vadd.f32 %v744_v23, %v221_v63  ;;  %v250_v11 = vmax.f32 %v230_v5, 0.0 }
  0xe6   :  { %v844_v2 = vpop.f32.mrf.mxu0 }
  0xe7   :  { %v233_v4 = vadd.f32 %v844_v2, %v744_v23  ;;  %869 = vmatprep.mubr.bf16.mxu1 %v256_v0  ;;  %v248_v9 = vmax.f32 %v222_v3, 0.0 }
  0xe8   :  { %v224_v6 = vpop.f32.mrf.mxu0  ;;  %870 = vmatmul.mubr.bf16.gmra.mxu1 %v257_v1 }
  0xe9   :  { %v225_v7 = vadd.f32 %v744_v23, %v224_v6  ;;  %v251_v8 = vmax.f32 %v233_v4, 0.0 }
  0xeb   :  { %v249_v10 = vmax.f32 %v225_v7, 0.0  ;;  %v259_v13 = vpack.c.bf16 %v251_v8, %v250_v11  ;;  %v14_v8 = vstv %s1192_s8 }
  0xec   :  { %15 = vst [vmem:[#allocation2] sm:$0x1] %v14_v8 }
  0xed   :  { %v258_v12 = vpack.c.bf16 %v249_v10, %v248_v9  ;;  %v1067_v9 = vld [vmem:[%s1193_s6] ss:$0 sm:$0xff] }
  0xef   :  { %873 = vmatprep.mubr.bf16.mxu1 %v258_v12 }
  0xf0   :  { %874 = vmatmul.mubr.bf16.gmra.mxu1 %v259_v13  ;;  %v1073_v13 = vld [vmem:[%s1194_s7] ss:$0 sm:$0xff] }
 0x198   :  { %v863_v15 = vpop.f32.mrf.mxu1 }
 0x199   :  { %v374_v21 = vadd.f32 %v863_v15, %v763_v17 }
 0x19a   :  { %v365_v16 = vpop.f32.mrf.mxu1 }
 0x19b   :  { %v366_v19 = vadd.f32 %v763_v17, %v365_v16  ;;  %v430_v28 = vmax.f32 %v374_v21, 0.0 }
 0x19c   :  { %v864_v18 = vpop.f32.mrf.mxu1 }
 0x19d   :  { %v377_v20 = vadd.f32 %v864_v18, %v763_v17  ;;  %v428_v26 = vmax.f32 %v366_v19, 0.0 }
 0x19e   :  { %v368_v22 = vpop.f32.mrf.mxu1 }
 0x19f   :  { %v369_v23 = vadd.f32 %v763_v17, %v368_v22  ;;  %v431_v24 = vmax.f32 %v377_v20, 0.0 }
 0x1a0   :  { %v867_v25 = vpop.f32.mrf.mxu1 }
 0x1a1   :  { %v429_v27 = vmax.f32 %v369_v23, 0.0  ;;  %v445_v31 = vpack.c.bf16 %v431_v24, %v430_v28  ;;  %v390_v35 = vadd.f32 %v867_v25, %v763_v17 }
 0x1a2   :  { %v381_v29 = vpop.f32.mrf.mxu1 }
 0x1a3   :  { %v444_v30 = vpack.c.bf16 %v429_v27, %v428_v26  ;;  %v382_v33 = vadd.f32 %v763_v17, %v381_v29  ;;  %v434_v42 = vmax.f32 %v390_v35, 0.0 }
 0x1a4   :  { %v868_v32 = vpop.f32.mrf.mxu1 }
 0x1a5   :  { %v393_v34 = vadd.f32 %v868_v32, %v763_v17  ;;  %885 = vmatprep.mubr.msk.bf16.mxu0 %vm491_vm1, %v444_v30  ;;  %v432_v40 = vmax.f32 %v382_v33, 0.0 }
 0x1a6   :  { %v384_v36 = vpop.f32.mrf.mxu1  ;;  %886 = vmatmul.mubr.msk.bf16.vlgmr.msra.gmra.mxu0 %vm491_vm1, %v445_v31 }
 0x1a7   :  { %v385_v37 = vadd.f32 %v763_v17, %v384_v36  ;;  %v435_v38 = vmax.f32 %v393_v34, 0.0 }
 0x1a8   :  { %v871_v39 = vpop.f32.mrf.mxu1 }
 0x1a9   :  { %v433_v41 = vmax.f32 %v385_v37, 0.0  ;;  %v447_v45 = vpack.c.bf16 %v435_v38, %v434_v42  ;;  %v406_v49 = vadd.f32 %v871_v39, %v763_v17 }
 0x1aa   :  { %v397_v43 = vpop.f32.mrf.mxu1 }
 0x1ab   :  { %v446_v44 = vpack.c.bf16 %v433_v41, %v432_v40  ;;  %v398_v47 = vadd.f32 %v763_v17, %v397_v43  ;;  %v438_v56 = vmax.f32 %v406_v49, 0.0 }
 0x1ac   :  { %v872_v46 = vpop.f32.mrf.mxu1 }
 0x1ad   :  { %v409_v48 = vadd.f32 %v872_v46, %v763_v17  ;;  %889 = vmatprep.mubr.msk.bf16.mxu0 %vm491_vm1, %v446_v44  ;;  %v436_v54 = vmax.f32 %v398_v47, 0.0 }
 0x1ae   :  { %v400_v50 = vpop.f32.mrf.mxu1  ;;  %890 = vmatmul.mubr.msk.bf16.gmra.mxu0 %vm491_vm1, %v447_v45 }
 0x1af   :  { %v401_v51 = vadd.f32 %v763_v17, %v400_v50  ;;  %v439_v52 = vmax.f32 %v409_v48, 0.0 }
 0x1b0   :  { %v875_v53 = vpop.f32.mrf.mxu1 }
 0x1b1   :  { %v437_v55 = vmax.f32 %v401_v51, 0.0  ;;  %v449_v59 = vpack.c.bf16 %v439_v52, %v438_v56  ;;  %v422_v63 = vadd.f32 %v875_v53, %v763_v17 }
 0x1b2   :  { %v413_v57 = vpop.f32.mrf.mxu1 }
 0x1b3   :  { %v448_v58 = vpack.c.bf16 %v437_v55, %v436_v54  ;;  %v414_v61 = vadd.f32 %v763_v17, %v413_v57  ;;  %v442_v5 = vmax.f32 %v422_v63, 0.0 }
 0x1b4   :  { %v876_v60 = vpop.f32.mrf.mxu1 }
 0x1b5   :  { %v425_v62 = vadd.f32 %v876_v60, %v763_v17  ;;  %893 = vmatprep.mubr.msk.bf16.mxu0 %vm491_vm1, %v448_v58  ;;  %v440_v3 = vmax.f32 %v414_v61, 0.0 }
 0x1b6   :  { %v416_v0 = vpop.f32.mrf.mxu1  ;;  %894 = vmatmul.mubr.msk.bf16.gmra.mxu0 %vm491_vm1, %v449_v59 }
 0x1b7   :  { %v417_v1 = vadd.f32 %v763_v17, %v416_v0  ;;  %v443_v2 = vmax.f32 %v425_v62, 0.0 }
 0x1b9   :  { %v441_v4 = vmax.f32 %v417_v1, 0.0  ;;  %v451_v7 = vpack.c.bf16 %v443_v2, %v442_v5 }
 0x1bb   :  { %v450_v6 = vpack.c.bf16 %v441_v4, %v440_v3 }
 0x1bd   :  { %897 = vmatprep.mubr.msk.bf16.mxu0 %vm491_vm1, %v450_v6 }
 0x1be   :  { %898 = vmatmul.mubr.msk.bf16.gmra.mxu0 %vm491_vm1, %v451_v7 }
 0x266   :  { %v887_v10 = vpop.f32.mrf.mxu0 }
 0x267   :  { %v559_v11 = vadd.f32 %v887_v10, %v1067_v9 }
 0x268   :  { %v550_v12 = vpop.f32.mrf.mxu0 }
 0x269   :  { %v615_v14 = vmax.f32 %v559_v11, 0.0  ;;  %v551_v15 = vadd.f32 %v1067_v9, %v550_v12 }
 0x26a   :  { %v888_v16 = vpop.f32.mrf.mxu0 }
 0x26b   :  { %v613_v17 = vmax.f32 %v551_v15, 0.0  ;;  %v562_v18 = vadd.f32 %v888_v16, %v1067_v9  ;;  %v638_v19 = vmul.f32 %v1073_v13, %v615_v14 }
 0x26c   :  { %v553_v20 = vpop.f32.mrf.mxu0 }
 0x26d   :  { %v616_v21 = vmax.f32 %v562_v18, 0.0  ;;  %v554_v22 = vadd.f32 %v1067_v9, %v553_v20  ;;  %v658_v23 = vsel %vm114_vm0, %v638_v19, 0.0  ;;  %v636_v24 = vmul.f32 %v1073_v13, %v613_v17 }
 0x26e   :  { %659 = vadd.xlane.f32.xlu1 %v658_v23  ;;  %v891_v25 = vpop.f32.mrf.mxu0 }
 0x26f   :  { %v614_v26 = vmax.f32 %v554_v22, 0.0  ;;  %v575_v27 = vadd.f32 %v891_v25, %v1067_v9  ;;  %v652_v28 = vsel %vm114_vm0, %v636_v24, 0.0  ;;  %v639_v29 = vmul.f32 %v1073_v13, %v616_v21 }
 0x270   :  { %v566_v30 = vpop.f32.mrf.mxu0  ;;  %653 = vadd.xlane.f32.xlu0 %v652_v28  ;;  %v786_v28 = vld [vmem:[#allocation2] ss:$0 sm:$0xff] }
 0x271   :  { %v619_v31 = vmax.f32 %v575_v27, 0.0  ;;  %v567_v32 = vadd.f32 %v1067_v9, %v566_v30  ;;  %v661_v33 = vsel %vm114_vm0, %v639_v29, 0.0  ;;  %v637_v34 = vmul.f32 %v1073_v13, %v614_v26 }
 0x272   :  { %662 = vadd.xlane.f32.xlu1 %v661_v33  ;;  %v892_v35 = vpop.f32.mrf.mxu0 }
 0x273   :  { %v617_v36 = vmax.f32 %v567_v32, 0.0  ;;  %v578_v37 = vadd.f32 %v892_v35, %v1067_v9  ;;  %v655_v38 = vsel %vm114_vm0, %v637_v34, 0.0  ;;  %v642_v39 = vmul.f32 %v1073_v13, %v619_v31 }
 0x274   :  { %v569_v40 = vpop.f32.mrf.mxu0  ;;  %656 = vadd.xlane.f32.xlu0 %v655_v38 }
 0x275   :  { %v620_v41 = vmax.f32 %v578_v37, 0.0  ;;  %v570_v42 = vadd.f32 %v1067_v9, %v569_v40  ;;  %v670_v44 = vsel %vm114_vm0, %v642_v39, 0.0  ;;  %v640_v48 = vmul.f32 %v1073_v13, %v617_v36 }
 0x276   :  { %v895_v43 = vpop.f32.mrf.mxu0 }
 0x277   :  { %v618_v45 = vmax.f32 %v570_v42, 0.0  ;;  %v591_v46 = vadd.f32 %v895_v43, %v1067_v9  ;;  %v643_v47 = vmul.f32 %v1073_v13, %v620_v41  ;;  %v664_v57 = vsel %vm114_vm0, %v640_v48, 0.0 }
 0x278   :  { %v582_v49 = vpop.f32.mrf.mxu0  ;;  %671 = vadd.xlane.f32.xlu0 %v670_v44 }
 0x279   :  { %v623_v50 = vmax.f32 %v591_v46, 0.0  ;;  %v583_v51 = vadd.f32 %v1067_v9, %v582_v49  ;;  %v673_v52 = vsel %vm114_vm0, %v643_v47, 0.0  ;;  %v641_v53 = vmul.f32 %v1073_v13, %v618_v45 }
 0x27a   :  { %674 = vadd.xlane.f32.xlu1 %v673_v52  ;;  %v896_v54 = vpop.f32.mrf.mxu0 }
 0x27b   :  { %v621_v55 = vmax.f32 %v583_v51, 0.0  ;;  %v594_v56 = vadd.f32 %v896_v54, %v1067_v9  ;;  %v646_v58 = vmul.f32 %v1073_v13, %v623_v50  ;;  %v667_v62 = vsel %vm114_vm0, %v641_v53, 0.0 }
 0x27c   :  { %v585_v59 = vpop.f32.mrf.mxu0  ;;  %665 = vadd.xlane.f32.xlu0 %v664_v57 }
 0x27d   :  { %v624_v60 = vmax.f32 %v594_v56, 0.0  ;;  %v586_v61 = vadd.f32 %v1067_v9, %v585_v59  ;;  %v682_v0 = vsel %vm114_vm0, %v646_v58, 0.0  ;;  %v644_v4 = vmul.f32 %v1073_v13, %v621_v55 }
 0x27e   :  { %v899_v63 = vpop.f32.mrf.mxu0  ;;  %668 = vadd.xlane.f32.xlu1 %v667_v62 }
 0x27f   :  { %v622_v1 = vmax.f32 %v586_v61, 0.0  ;;  %v607_v2 = vadd.f32 %v899_v63, %v1067_v9  ;;  %v647_v3 = vmul.f32 %v1073_v13, %v624_v60  ;;  %v676_v15 = vsel %vm114_vm0, %v644_v4, 0.0 }
 0x280   :  { %v598_v5 = vpop.f32.mrf.mxu0  ;;  %683 = vadd.xlane.f32.xlu0 %v682_v0 }
 0x281   :  { %v599_v6 = vadd.f32 %v1067_v9, %v598_v5  ;;  %v685_v7 = vsel %vm114_vm0, %v647_v3, 0.0  ;;  %v645_v8 = vmul.f32 %v1073_v13, %v622_v1  ;;  %v627_v11 = vmax.f32 %v607_v2, 0.0 }
 0x282   :  { %v900_v10 = vpop.f32.mrf.mxu0  ;;  %686 = vadd.xlane.f32.xlu1 %v685_v7 }
 0x283   :  { %v625_v12 = vmax.f32 %v599_v6, 0.0  ;;  %v610_v14 = vadd.f32 %v900_v10, %v1067_v9  ;;  %v679_v18 = vsel %vm114_vm0, %v645_v8, 0.0  ;;  %v650_v23 = vmul.f32 %v1073_v13, %v627_v11 }
 0x284   :  { %v601_v16 = vpop.f32.mrf.mxu0  ;;  %677 = vadd.xlane.f32.xlu0 %v676_v15 }
 0x285   :  { %v602_v17 = vadd.f32 %v1067_v9, %v601_v16  ;;  %v648_v19 = vmul.f32 %v1073_v13, %v625_v12  ;;  %v628_v20 = vmax.f32 %v610_v14, 0.0  ;;  %v694_v26 = vsel %vm114_vm0, %v650_v23, 0.0 }
 0x286   :  { %680 = vadd.xlane.f32.xlu1 %v679_v18 }
 0x287   :  { %v626_v21 = vmax.f32 %v602_v17, 0.0  ;;  %v688_v22 = vsel %vm114_vm0, %v648_v19, 0.0  ;;  %v651_v9 = vmul.f32 %v1073_v13, %v628_v20 }
 0x288   :  { %689 = vadd.xlane.f32.xlu0 %v688_v22 }
 0x289   :  { %v649_v24 = vmul.f32 %v1073_v13, %v626_v21  ;;  %v697_v27 = vsel %vm114_vm0, %v651_v9, 0.0 }
 0x28b   :  { %v691_v25 = vsel %vm114_vm0, %v649_v24, 0.0 }
 0x28c   :  { %692 = vadd.xlane.f32.xlu1 %v691_v25  ;;  %695 = vadd.xlane.f32.xlu0 %v694_v26 }
 0x290   :  { %698 = vadd.xlane.f32.xlu1 %v697_v27 }
 0x2f7   :  { %v660_v29 = vpop.xlane.xlu1 %659 }
 0x2f8   :  { %v709_v30 = vadd.f32 %v786_v28, %v660_v29 }
 0x2f9   :  { %v654_v31 = vpop.xlane.xlu0 %653 }
 0x2fa   :  { %726 = vst.msk [vmem:[%s1195_s9 + $0x10] sm:$0xff] %vm723_vm2, %v709_v30  ;;  %v707_v32 = vadd.f32 %v786_v28, %v654_v31 }
 0x2fb   :  { %v663_v33 = vpop.xlane.xlu1 %662 }
 0x2fc   :  { %724 = vst.msk [vmem:[%s1195_s9] sm:$0xff] %vm723_vm2, %v707_v32  ;;  %v710_v13 = vadd.f32 %v786_v28, %v663_v33 }
 0x2fd   :  { %v657_v34 = vpop.xlane.xlu0 %656 }
 0x2fe   :  { %727 = vst.msk [vmem:[%s1195_s9 + $0x18] sm:$0xff] %vm723_vm2, %v710_v13  ;;  %v708_v35 = vadd.f32 %v786_v28, %v657_v34 }
 0x300   :  { %725 = vst.msk [vmem:[%s1195_s9 + $0x8] sm:$0xff] %vm723_vm2, %v708_v35 }
 0x301   :  { %v672_v36 = vpop.xlane.xlu0 %671 }
 0x302   :  { %v713_v37 = vadd.f32 %v786_v28, %v672_v36 }
 0x303   :  { %v675_v38 = vpop.xlane.xlu1 %674 }
 0x304   :  { %730 = vst.msk [vmem:[%s1195_s9 + $0x30] sm:$0xff] %vm723_vm2, %v713_v37  ;;  %v714_v39 = vadd.f32 %v786_v28, %v675_v38 }
 0x305   :  { %v666_v40 = vpop.xlane.xlu0 %665 }
 0x306   :  { %731 = vst.msk [vmem:[%s1195_s9 + $0x38] sm:$0xff] %vm723_vm2, %v714_v39  ;;  %v711_v41 = vadd.f32 %v786_v28, %v666_v40 }
 0x307   :  { %v669_v42 = vpop.xlane.xlu1 %668 }
 0x308   :  { %728 = vst.msk [vmem:[%s1195_s9 + $0x20] sm:$0xff] %vm723_vm2, %v711_v41  ;;  %v712_v43 = vadd.f32 %v786_v28, %v669_v42 }
 0x309   :  { %v684_v44 = vpop.xlane.xlu0 %683 }
 0x30a   :  { %729 = vst.msk [vmem:[%s1195_s9 + $0x28] sm:$0xff] %vm723_vm2, %v712_v43  ;;  %v717_v45 = vadd.f32 %v786_v28, %v684_v44 }
 0x30b   :  { %v687_v46 = vpop.xlane.xlu1 %686 }
 0x30c   :  { %734 = vst.msk [vmem:[%s1195_s9 + $0x50] sm:$0xff] %vm723_vm2, %v717_v45  ;;  %v718_v47 = vadd.f32 %v786_v28, %v687_v46 }
 0x30d   :  { %v678_v48 = vpop.xlane.xlu0 %677 }
 0x30e   :  { %735 = vst.msk [vmem:[%s1195_s9 + $0x58] sm:$0xff] %vm723_vm2, %v718_v47  ;;  %v715_v49 = vadd.f32 %v786_v28, %v678_v48 }
 0x30f   :  { %v681_v50 = vpop.xlane.xlu1 %680 }
 0x310   :  { %732 = vst.msk [vmem:[%s1195_s9 + $0x40] sm:$0xff] %vm723_vm2, %v715_v49  ;;  %v716_v51 = vadd.f32 %v786_v28, %v681_v50 }
 0x311   :  { %v690_v52 = vpop.xlane.xlu0 %689 }
 0x312   :  { %733 = vst.msk [vmem:[%s1195_s9 + $0x48] sm:$0xff] %vm723_vm2, %v716_v51  ;;  %v719_v53 = vadd.f32 %v786_v28, %v690_v52 }
 0x314   :  { %736 = vst.msk [vmem:[%s1195_s9 + $0x60] sm:$0xff] %vm723_vm2, %v719_v53 }
 0x315   :  { %v693_v54 = vpop.xlane.xlu1 %692  ;;  %v696_v55 = vpop.xlane.xlu0 %695 }
 0x316   :  { %v720_v56 = vadd.f32 %v786_v28, %v693_v54  ;;  %v721_v57 = vadd.f32 %v786_v28, %v696_v55 }
 0x318   :  { %737 = vst.msk [vmem:[%s1195_s9 + $0x68] sm:$0xff] %vm723_vm2, %v720_v56  ;;  %738 = vst.msk [vmem:[%s1195_s9 + $0x70] sm:$0xff] %vm723_vm2, %v721_v57 }
 0x319   :  { %v699_v58 = vpop.xlane.xlu1 %698 }
 0x31a   :  { %v722_v59 = vadd.f32 %v786_v28, %v699_v58 }
 0x31c   :  { %739 = vst.msk [vmem:[%s1195_s9 + $0x78] sm:$0xff] %vm723_vm2, %v722_v59 }

</bundles_post_ra>
